<compile_context>
chip_gen: v7x
topology: tpu7x:2x2x1
jax: 0.10.0
libtpu: 0.0.40
codegen_flags: <defaults>
</compile_context>

<pallas_src>
import functools

import jax
import jax.numpy as jnp
from jax import lax
from jax.experimental import pallas as pl
from jax.experimental.pallas import tpu as pltpu

_LANES = 128                      # lanes per vreg (fast axis)
_ACC_SUB = 8                      # sublane rows of the resident f32 accumulator
_CHUNK_ROWS = 256                 # rows folded per inner fori_loop iteration
_TILE_BYTES = 2 * 1024 * 1024     # per-input, per-pipeline-buffer block bytes
_NUM_CORE_SPLITS = 2              # leading "parallel" axis (v7x megacore)
_MIN_PALLAS_ELEMS = 1 << 17       # below this, plain XLA reduce is faster


def _round_up(x, m):
    return ((x + m - 1) // m) * m


def _vq_sum_kernel(a_ref, b_ref, out_ref, *, rows_valid, row_tile, inner_steps):
    """Accumulates sum(a + b) over this core's slice of row-blocks.

    a_ref / b_ref : (row_tile, 128) blocks in their native dtypes.
    out_ref       : (1, 8, 128) f32 resident partial-sum accumulator
                    (one block per core-split).
    """
    c = pl.program_id(0)   # core-split index ("parallel")
    i = pl.program_id(1)   # streaming / reduction step ("arbitrary")

    @pl.when(i == 0)
    def _():
        out_ref[...] = jnp.zeros_like(out_ref)

    # Unclamped logical row offset of this block.  The index_map clamps the
    # DMA so it never reads out of bounds; rows past `rows_valid` (partial
    # trailing block, or a fully out-of-range clamped step) are masked to 0.
    block_start = (c * inner_steps + i) * row_tile
    n_chunks = row_tile // _CHUNK_ROWS

    def body(j, carry):
        r0 = pl.multiple_of(j * _CHUNK_ROWS, _CHUNK_ROWS)
        a = a_ref[pl.ds(r0, _CHUNK_ROWS), :].astype(jnp.float32)
        b = b_ref[pl.ds(r0, _CHUNK_ROWS), :].astype(jnp.float32)
        term = a + b
        row_ids = (block_start + j * _CHUNK_ROWS
                   + lax.broadcasted_iota(jnp.int32, (_CHUNK_ROWS, 1), 0))
        term = jnp.where(row_ids < rows_valid, term, 0.0)
        # Fold the chunk onto the (8, 128) accumulator: pure VPU adds, no
        # cross-lane work until the (tiny) wrapper-side final reduce.
        out_ref[...] += jnp.sum(
            term.reshape(_CHUNK_ROWS // _ACC_SUB, _ACC_SUB, _LANES), axis=0)
        return carry

    lax.fori_loop(0, n_chunks, body, 0)


def vq_loss_pallas(commitment_loss, codebook_loss, *,
                   tile_bytes=_TILE_BYTES,
                   min_pallas_elems=_MIN_PALLAS_ELEMS):
    """mean(commitment_loss + codebook_loss) over all elements (f32 scalar)."""
    assert commitment_loss.shape == codebook_loss.shape, (
        commitment_loss.shape, codebook_loss.shape)
    n = int(commitment_loss.size)
    assert n > 0

    # Small-input fast path: the fixed pallas_call / relayout overhead is not
    # worth it until the arrays are HBM-resident and bandwidth-bound.
    if n < min_pallas_elems:
        return jnp.mean(commitment_loss.astype(jnp.float32)
                        + codebook_loss.astype(jnp.float32))

    a = commitment_loss.reshape(-1)
    b = codebook_loss.reshape(-1)

    # Lane-dense (rows, 128) layout in the NATIVE dtypes (upcast happens on
    # load inside the kernel).  Padding is only required when n is not a
    # multiple of 128 (adds <=127 zeros, which contribute 0 to the sum).
    n_pad = _round_up(n, _LANES)
    if n_pad != n:
        a = jnp.pad(a, (0, n_pad - n))
        b = jnp.pad(b, (0, n_pad - n))
    rows = n_pad // _LANES
    a2 = a.reshape(rows, _LANES)
    b2 = b.reshape(rows, _LANES)

    # Tile sizing: ~tile_bytes per input per pipeline buffer (x2 inputs,
    # x2 buffers).  Row tiles are multiples of 256, which also satisfies the
    # sublane packing of every dtype (8 f32 / 16 bf16 / 32 int8).
    itemsize = max(a2.dtype.itemsize, b2.dtype.itemsize)
    max_rows = max(_CHUNK_ROWS,
                   (tile_bytes // (_LANES * itemsize)) // _CHUNK_ROWS * _CHUNK_ROWS)
    row_tile = min(max_rows, _round_up(rows, _CHUNK_ROWS))

    n_blocks = pl.cdiv(rows, row_tile)
    num_splits = _NUM_CORE_SPLITS if n_blocks >= _NUM_CORE_SPLITS else 1
    inner_steps = pl.cdiv(n_blocks, num_splits)

    def in_index_map(c, i):
        # Clamp so the (rare) trailing steps of the core-split never DMA out
        # of bounds; their contribution is masked to zero inside the kernel.
        return (jnp.minimum(c * inner_steps + i, n_blocks - 1), 0)

    kernel = functools.partial(_vq_sum_kernel, rows_valid=rows,
                               row_tile=row_tile, inner_steps=inner_steps)

    partials = pl.pallas_call(
        kernel,
        out_shape=jax.ShapeDtypeStruct((num_splits, _ACC_SUB, _LANES),
                                       jnp.float32),
        grid_spec=pltpu.PrefetchScalarGridSpec(
            num_scalar_prefetch=0,
            grid=(num_splits, inner_steps),
            in_specs=[
                pl.BlockSpec((row_tile, _LANES), in_index_map),
                pl.BlockSpec((row_tile, _LANES), in_index_map),
            ],
            out_specs=pl.BlockSpec((1, _ACC_SUB, _LANES),
                                   lambda c, i: (c, 0, 0)),
        ),
        compiler_params=pltpu.CompilerParams(
            dimension_semantics=("parallel", "arbitrary"),
            vmem_limit_bytes=32 * 1024 * 1024,
        ),
        cost_estimate=pl.CostEstimate(
            flops=3 * n_pad,
            transcendentals=0,
            bytes_accessed=(n_pad * (a2.dtype.itemsize + b2.dtype.itemsize)
                            + num_splits * _ACC_SUB * _LANES * 4),
        ),
    )(a2, b2)

    # Tiny epilogue: combine the per-core (8, 128) partials and scale by 1/n.
    return jnp.sum(partials) * jnp.float32(1.0 / n)


def vq_loss(inputs, target=None):
    """Mirrors VQLoss.forward(input, target) -> scalar. `target` is unused."""
    del target
    return vq_loss_pallas(inputs["commitment_loss"], inputs["codebook_loss"])


def vq_loss_ref(commitment_loss, codebook_loss):
    return jnp.mean(commitment_loss.astype(jnp.float32)
                    + codebook_loss.astype(jnp.float32))


if __name__ == "__main__":
    key = jax.random.PRNGKey(0)
    keys = jax.random.split(key, 8)

    # Primary small shapes implied by the loss module: per-element VQ loss
    # maps of shape (batch=2, seq=8, hidden=32).
    B, T, D = 2, 8, 32
    commitment = jax.random.uniform(keys[0], (B, T, D), dtype=jnp.float32)
    codebook = jax.random.uniform(keys[1], (B, T, D), dtype=jnp.float32)
    inp = {"commitment_loss": commitment, "codebook_loss": codebook}

    # 1) Force the Pallas kernel on the small primary input (single partial
    #    block, in-kernel row masking instead of padding).
    out1 = jax.block_until_ready(
        vq_loss_pallas(commitment, codebook, min_pallas_elems=0))
    ref1 = vq_loss_ref(commitment, codebook)
    assert jnp.allclose(out1, ref1, rtol=1e-6, atol=1e-6), (out1, ref1)

    # 2) Public API (small input -> XLA fast path) matches too.
    out2 = jax.block_until_ready(vq_loss(inp, target=None))
    assert jnp.allclose(out2, ref1, rtol=1e-6, atol=1e-6), (out2, ref1)

    # 3) Two-way core split with a partial (masked) trailing block.
    c3 = jax.random.normal(keys[2], (8, 40, 128), dtype=jnp.float32)
    b3 = jax.random.normal(keys[3], (8, 40, 128), dtype=jnp.float32)
    out3 = jax.block_until_ready(
        vq_loss_pallas(c3, b3, tile_bytes=128 * 1024, min_pallas_elems=0))
    ref3 = vq_loss_ref(c3, b3)
    assert jnp.allclose(out3, ref3, rtol=1e-5, atol=1e-6), (out3, ref3)

    # 4) Multi-step accumulation per core plus a clamped/fully-masked tail step.
    c4 = jax.random.normal(keys[4], (32, 40, 128), dtype=jnp.float32)
    b4 = jax.random.normal(keys[5], (32, 40, 128), dtype=jnp.float32)
    out4 = jax.block_until_ready(
        vq_loss_pallas(c4, b4, tile_bytes=128 * 1024, min_pallas_elems=0))
    ref4 = vq_loss_ref(c4, b4)
    assert jnp.allclose(out4, ref4, rtol=1e-5, atol=1e-6), (out4, ref4)

    # 5) Native bf16 streaming (no wrapper-side upcast; f32 accumulation).
    c5 = jax.random.normal(keys[6], (16, 64, 128), dtype=jnp.bfloat16)
    b5 = jax.random.normal(keys[7], (16, 64, 128), dtype=jnp.bfloat16)
    out5 = jax.block_until_ready(vq_loss_pallas(c5, b5))
    ref5 = vq_loss_ref(c5, b5)
    assert jnp.allclose(out5, ref5, rtol=1e-5, atol=1e-6), (out5, ref5)

    # 6) Irregular element count (not a multiple of 128): tiny lane-pad path.
    c6 = jax.random.normal(keys[0], (3, 5, 7), dtype=jnp.float32)
    b6 = jax.random.normal(keys[1], (3, 5, 7), dtype=jnp.float32)
    out6 = jax.block_until_ready(vq_loss_pallas(c6, b6, min_pallas_elems=0))
    ref6 = vq_loss_ref(c6, b6)
    assert jnp.allclose(out6, ref6, rtol=1e-5, atol=1e-6), (out6, ref6)

    print("KERNEL_OK")
</pallas_src>

<mosaic_0001>
module attributes {stable_mosaic.version = 11 : i64} {
  func.func @_vq_sum_kernel(%arg0: i32, %arg1: i32, %arg2: memref<256x128xf32, #tpu.memory_space<vmem>>, %arg3: memref<256x128xf32, #tpu.memory_space<vmem>>, %arg4: memref<1x8x128xf32, #tpu.memory_space<vmem>>) attributes {dimension_semantics = [#tpu.dimension_semantics<parallel>, #tpu.dimension_semantics<arbitrary>], iteration_bounds = array<i64: 1, 1>, scalar_prefetch = 0 : i64, scratch_operands = 0 : i64, tpu.core_type = #tpu.core_type<tc>, window_params = [{transform_indices = @transform_0, window_bounds = array<i64: 256, 128>}, {transform_indices = @transform_1, window_bounds = array<i64: 256, 128>}, {transform_indices = @transform_2, window_bounds = array<i64: 1, 8, 128>}]} {
    %c0_i32 = arith.constant 0 : i32
    %0 = arith.cmpi eq, %arg1, %c0_i32 : i32
    %1 = arith.extui %0 : i1 to i32
    %c0_i32_0 = arith.constant 0 : i32
    %2 = arith.cmpi ne, %1, %c0_i32_0 : i32
    scf.if %2 {
      %cst_13 = arith.constant 0.000000e+00 : f32
      %30 = vector.broadcast %cst_13 : f32 to vector<1x8x128xf32>
      %c0_14 = arith.constant 0 : index
      %c0_15 = arith.constant 0 : index
      %c0_16 = arith.constant 0 : index
      %31 = vector.load %arg4[%c0_14, %c0_15, %c0_16] : memref<1x8x128xf32, #tpu.memory_space<vmem>>, vector<1x8x128xf32>
      tpu.vector_store %arg4[%c0_14, %c0_15, %c0_16], %30 {strides = array<i32>} : memref<1x8x128xf32, #tpu.memory_space<vmem>>, vector<1x8x128xf32>,
    } else {
    }
    %c1_i32 = arith.constant 1 : i32
    %3 = arith.muli %arg0, %c1_i32 : i32
    %4 = arith.addi %3, %arg1 : i32
    %c256_i32 = arith.constant 256 : i32
    %5 = arith.muli %4, %c256_i32 : i32
    %c0_i32_1 = arith.constant 0 : i32
    %c256_i32_2 = arith.constant 256 : i32
    %6 = arith.muli %c0_i32_1, %c256_i32_2 : i32
    %7 = tpu.assume_multiple %6, 256 : i32
    %8 = arith.index_cast %7 : i32 to index
    %c0 = arith.constant 0 : index
    %9 = vector.load %arg2[%8, %c0] : memref<256x128xf32, #tpu.memory_space<vmem>>, vector<256x128xf32>
    %10 = arith.index_cast %7 : i32 to index
    %c0_3 = arith.constant 0 : index
    %11 = vector.load %arg3[%10, %c0_3] : memref<256x128xf32, #tpu.memory_space<vmem>>, vector<256x128xf32>
    %12 = arith.addf %9, %11 : vector<256x128xf32>
    %c256_i32_4 = arith.constant 256 : i32
    %13 = arith.muli %c0_i32_1, %c256_i32_4 : i32
    %14 = arith.addi %5, %13 : i32
    %15 = tpu.iota {dimensions = array<i32: 0>} : vector<256x1xi32>
    %16 = vector.broadcast %14 : i32 to vector<256x1xi32>
    %17 = arith.addi %16, %15 : vector<256x1xi32>
    %c4_i32 = arith.constant 4 : i32
    %18 = vector.broadcast %c4_i32 : i32 to vector<256x1xi32>
    %19 = arith.cmpi slt, %17, %18 : vector<256x1xi32>
    %cst = arith.constant 0.000000e+00 : f32
    %20 = vector.shape_cast %19 : vector<256x1xi1> to vector<256x1xi1>
    %21 = vector.broadcast %20 : vector<256x1xi1> to vector<256x128xi1>
    %22 = vector.broadcast %cst : f32 to vector<256x128xf32>
    %23 = arith.select %21, %12, %22 : vector<256x128xi1>, vector<256x128xf32>
    %c0_5 = arith.constant 0 : index
    %c0_6 = arith.constant 0 : index
    %c0_7 = arith.constant 0 : index
    %24 = vector.load %arg4[%c0_5, %c0_6, %c0_7] : memref<1x8x128xf32, #tpu.memory_space<vmem>>, vector<1x8x128xf32>
    %25 = vector.shape_cast %23 : vector<256x128xf32> to vector<32x8x128xf32>
    %cst_8 = arith.constant dense<0.000000e+00> : vector<8x128xf32>
    %26 = vector.multi_reduction <add>, %25, %cst_8 [0] : vector<32x8x128xf32> to vector<8x128xf32>
    %27 = vector.shape_cast %26 : vector<8x128xf32> to vector<1x8x128xf32>
    %28 = arith.addf %24, %27 : vector<1x8x128xf32>
    %c0_9 = arith.constant 0 : index
    %c0_10 = arith.constant 0 : index
    %c0_11 = arith.constant 0 : index
    %29 = vector.load %arg4[%c0_9, %c0_10, %c0_11] : memref<1x8x128xf32, #tpu.memory_space<vmem>>, vector<1x8x128xf32>
    tpu.vector_store %arg4[%c0_9, %c0_10, %c0_11], %28 {strides = array<i32>} : memref<1x8x128xf32, #tpu.memory_space<vmem>>, vector<1x8x128xf32>,
    %c1_i32_12 = arith.constant 1 : i32
    return
  }
  func.func @transform_0(%arg0: i32, %arg1: i32) -> (i32, i32) {
    %c1_i32 = arith.constant 1 : i32
    %0 = arith.muli %arg0, %c1_i32 : i32
    %1 = arith.addi %0, %arg1 : i32
    %c0_i32 = arith.constant 0 : i32
    %2 = arith.minsi %1, %c0_i32 : i32
    %c0_i32_0 = arith.constant 0 : i32
    %c0_i32_1 = arith.constant 0 : i32
    return %2, %c0_i32_0 : i32, i32
  }
  func.func @transform_1(%arg0: i32, %arg1: i32) -> (i32, i32) {
    %c1_i32 = arith.constant 1 : i32
    %0 = arith.muli %arg0, %c1_i32 : i32
    %1 = arith.addi %0, %arg1 : i32
    %c0_i32 = arith.constant 0 : i32
    %2 = arith.minsi %1, %c0_i32 : i32
    %c0_i32_0 = arith.constant 0 : i32
    %c0_i32_1 = arith.constant 0 : i32
    return %2, %c0_i32_0 : i32, i32
  }
  func.func @transform_2(%arg0: i32, %arg1: i32) -> (i32, i32, i32) {
    %c0_i32 = arith.constant 0 : i32
    %c0_i32_0 = arith.constant 0 : i32
    %c0_i32_1 = arith.constant 0 : i32
    return %arg0, %c0_i32, %c0_i32_0 : i32, i32, i32
  }
}

</mosaic_0001>

<bundles_post_ra>
// kernel: tpu_custom_call.1
= control target key start
LH: loop header
LB: loop body
LE: loop exit
PB: predicated region body
PF: predicated region fallthrough
CT: control target
= control target key end

     0   :  { %7 = vsyncpa [#allocation3], 0  ;;  %s557_s0 = inlined_call_operand.hbm [shape: f32[4,128], index: 0, kind: input, shape index: {}]   ;;  %s558_s1 = inlined_call_operand.hbm [shape: f32[4,128], index: 1, kind: input, shape index: {}]   ;;  %s559_s2 = inlined_call_operand.hbm [shape: f32[1,8,128], index: 2, kind: output, shape index: {}]  }
   0x1   :  { %8 = vsyncpa [#allocation6], 0 }
   0x2   :  { %9 = vsyncpa [#allocation4], 0 }
   0x3   :  { %20 = vsyncadd [#allocation3], 4032  ;;  %s501_s9 = smov [#allocation2]   ;;  %s429_s13 = scalar_lea.hbm %s557_s0, 64 }
   0x4   :  { %s25_s10 = sshll.u32 %s501_s9, 4  ;;  %p430_p0 = scmp.ne.s32.totalorder %s557_s0, %s429_s13  ;;  %s26_s10 = int_to_ptr.vmem [resolvable:$true] %s25_s10 }
   0x5   :  { %p433_p1 = scmp.lt.u32.totalorder %s429_s13, %s557_s0 }
   0x7   :  { %p435_p2 = pnand %p433_p1, %p430_p0 }
   0x9   :  { %438 = shalt.err (!%p435_p2)
}
   0xa   :  { %s439_s18 = scalar_lea.vmem %s26_s10, 64  ;;  %s443_s19 = scalar_lea.vmem %s26_s10, 4096 }
   0xb   :  { %p440_p3 = scmp.ne.s32.totalorder %s26_s10, %s439_s18  ;;  %p444_p4 = scmp.lt.s32.totalorder %s26_s10, %s26_s10 }
   0xc   :  { %p445_p5 = scmp.lt.s32.totalorder %s443_s19, %s439_s18 }
   0xe   :  { %p446_p6 = por %p445_p5, %p444_p4 }
  0x10   :  { %p447_p7 = pnand %p446_p6, %p440_p3 }
  0x12   :  { %450 = shalt.err (!%p447_p7)
}
  0x13   :  { %s502_s20 = smov 64   ;;  %s503_s21 = smov 4  }
  0x14   :  { %31 = dma.hbm_to_vmem [thread:$0]  %s557_s0, 64, %s26_s10, [#allocation3], %s502_s20, %s502_s20, %s503_s21  }
  0x15   :  { %42 = vsyncadd [#allocation6], 4032  ;;  %s504_s24 = smov [#allocation5]   ;;  %s451_s28 = scalar_lea.hbm %s558_s1, 64 }
  0x16   :  { %s47_s25 = sshll.u32 %s504_s24, 4  ;;  %p452_p8 = scmp.ne.s32.totalorder %s558_s1, %s451_s28  ;;  %s48_s25 = int_to_ptr.vmem [resolvable:$true] %s47_s25 }
  0x17   :  { %p455_p9 = scmp.lt.u32.totalorder %s451_s28, %s558_s1 }
  0x19   :  { %p457_p10 = pnand %p455_p9, %p452_p8 }
  0x1b   :  { %460 = shalt.err (!%p457_p10)
}
  0x1c   :  { %s461_s5 = scalar_lea.vmem %s48_s25, 64  ;;  %s465_s0 = scalar_lea.vmem %s48_s25, 4096 }
  0x1d   :  { %p462_p11 = scmp.ne.s32.totalorder %s48_s25, %s461_s5  ;;  %p466_p12 = scmp.lt.s32.totalorder %s48_s25, %s48_s25 }
  0x1e   :  { %p467_p13 = scmp.lt.s32.totalorder %s465_s0, %s461_s5 }
  0x20   :  { %p468_p0 = por %p467_p13, %p466_p12 }
  0x22   :  { %p469_p1 = pnand %p468_p0, %p462_p11 }
  0x24   :  { %472 = shalt.err (!%p469_p1)
}
  0x25   :  { %53 = dma.hbm_to_vmem [thread:$0]  %s558_s1, 64, %s48_s25, [#allocation6], %s502_s20, %s502_s20, %s503_s21  }
  0x26   :  { %495 = dma.done.wait [#allocation3], 4096  }
  0x27   :  { %496 = vsyncadd [#allocation3], 4294963200 }
  0x28   :  { %497 = dma.done.wait [#allocation6], 4096  }
  0x29   :  { %498 = vsyncadd [#allocation6], 4294963200  ;;  %v175_v0 = vlaneseq  ;;  %v79_v2 = vld [vmem:[#allocation2] sm:$0xff]  ;;  %s505_s8 = smov [#allocation7]  }
  0x2a   :  { %v111_v3 = vld [vmem:[#allocation5] sm:$0xff]  ;;  %s409_s9 = sshll.u32 %s505_s8, 4  ;;  %s410_s9 = int_to_ptr.vmem [resolvable:$true] %s409_s9 }
  0x2b   :  { %v176_v1 = vshrl.u32 %v175_v0, 7  ;;  %v143_v4 = vadd.f32 %v111_v3, %v79_v2  ;;  %s473_s10 = scalar_lea.vmem %s410_s9, 128  ;;  %p478_p3 = scmp.lt.s32.totalorder %s410_s9, %s410_s9 }
  0x2c   :  { %p474_p2 = scmp.ne.s32.totalorder %s410_s9, %s473_s10  ;;  %p479_p4 = scmp.lt.s32.totalorder %s473_s10, %s473_s10 }
  0x2d   :  { %vm241_vm0 = vcmp.lt.s32.totalorder %v176_v1, 4 }
  0x2e   :  { %v337_v5 = vsel %vm241_vm0, %v143_v4, 0.0  ;;  %p480_p5 = por %p479_p4, %p478_p3 }
  0x2f   :  { %402 = vst [vmem:[#allocation7] sm:$0xff] %v337_v5 }
  0x30   :  { %p481_p6 = pnand %p480_p5, %p474_p2 }
  0x32   :  { %484 = shalt.err (!%p481_p6)
}
  0x33   :  { %s485_s12 = scalar_lea.hbm %s559_s2, 128 }
  0x34   :  { %p486_p7 = scmp.ne.s32.totalorder %s559_s2, %s485_s12  ;;  %p489_p8 = scmp.lt.u32.totalorder %s485_s12, %s559_s2 }
  0x36   :  { %p491_p9 = pnand %p489_p8, %p486_p7 }
  0x38   :  { %494 = shalt.err (!%p491_p9)
}
  0x39   :  { %412 = dma.vmem_to_hbm [thread:$0]  %s410_s9, 128, %s559_s2, [#allocation4]  }
  0x3a   :  { %499 = dma.done.wait [#allocation4], 128  }
  0x3b   :  { %500 = vsyncadd [#allocation4], 4294967168 }
  0x3c   :  { %416 = vsyncpa [#allocation3], 1 }
  0x3d   :  { %417 = vsyncpa [#allocation6], 1 }
  0x3e   :  { %418 = vsyncpa [#allocation4], 1 }

</bundles_post_ra>
